<compile_context>
chip_gen: v5e
topology: v5e:2x2
jax: 0.10.0
libtpu: 0.0.40
codegen_flags: <defaults>
</compile_context>

<pallas_src>
import functools

import numpy as np
import jax
import jax.numpy as jnp
from jax.experimental import pallas as pl
from jax.experimental.pallas import tpu as pltpu

LANE = 128                      # feature dims padded to multiples of this
TILE_D = 128                    # dst-row stripe height in the fused kernel
VMEM_LIMIT = 32 * 1024 * 1024   # safe default on v5e/v6e/v7x for this tiling


def _round_up(x, m):
    return ((x + m - 1) // m) * m


def _pick_tile(extent, preferred):
    for t in preferred:
        if extent % t == 0:
            return t
    return extent


# ---------------------------------------------------------------------------
# Kernel 1: feature projection  ft = x @ W   (bf16 in, f32 accumulate, bf16 out)
# ---------------------------------------------------------------------------
def _project_kernel(x_ref, w_ref, o_ref, acc_ref):
    @pl.when(pl.program_id(2) == 0)
    def _():
        acc_ref[...] = jnp.zeros_like(acc_ref)

    acc_ref[...] += jnp.dot(x_ref[...], w_ref[...],
                            preferred_element_type=jnp.float32)

    @pl.when(pl.program_id(2) == pl.num_programs(2) - 1)
    def _():
        o_ref[...] = acc_ref[...].astype(o_ref.dtype)


def project(x_p, w_p):
    n, fin = x_p.shape
    _, fout = w_p.shape
    tm = _pick_tile(n, (256, 128))
    tn = _pick_tile(fout, (256, 128))
    tk = _pick_tile(fin, (512, 256, 128))
    return pl.pallas_call(
        _project_kernel,
        out_shape=jax.ShapeDtypeStruct((n, fout), jnp.bfloat16),
        grid_spec=pltpu.PrefetchScalarGridSpec(
            num_scalar_prefetch=0,
            grid=(n // tm, fout // tn, fin // tk),
            in_specs=[
                pl.BlockSpec((tm, tk), lambda i, j, k: (i, k)),
                pl.BlockSpec((tk, tn), lambda i, j, k: (k, j)),
            ],
            out_specs=pl.BlockSpec((tm, tn), lambda i, j, k: (i, j)),
            scratch_shapes=[pltpu.VMEM((tm, tn), jnp.float32)],
        ),
        compiler_params=pltpu.CompilerParams(
            dimension_semantics=("parallel", "parallel", "arbitrary"),
            vmem_limit_bytes=VMEM_LIMIT),
    )(x_p, w_p)


# ---------------------------------------------------------------------------
# Kernel 2: attention logits, computed once:
#   el[h, u] = <ft[u, h, :], attn_l[h]>   stored lane-major   (H, 1, N)
#   er[h, v] = <ft[v, h, :], attn_r[h]>   stored as a column  (H, N, 1)
# ---------------------------------------------------------------------------
def _logits_kernel(ft_ref, al_ref, ar_ref, el_ref, er_ref):
    ft = ft_ref[...]                                            # (tm, Dp) bf16
    # el as a lane-major row: (8, Dp) @ (tm, Dp)^T -> (8, tm), take row 0.
    al8 = jnp.broadcast_to(al_ref[0], (8, al_ref.shape[-1]))    # (8, Dp) bf16
    el8 = jax.lax.dot_general(al8, ft, (((1,), (1,)), ((), ())),
                              preferred_element_type=jnp.float32)
    el_ref[0] = el8[0:1, :]                                     # (1, tm)
    # er as a column: f32 elementwise reduce over the feature dim.
    er_ref[0] = jnp.sum(ft.astype(jnp.float32) * ar_ref[0].astype(jnp.float32),
                        axis=-1, keepdims=True)                 # (tm, 1)


def attention_logits(feat_hd, al_p, ar_p, num_heads, d_pad):
    n_pad = feat_hd.shape[0]
    tm = _pick_tile(n_pad, (256, 128))
    return pl.pallas_call(
        _logits_kernel,
        out_shape=(jax.ShapeDtypeStruct((num_heads, 1, n_pad), jnp.float32),
                   jax.ShapeDtypeStruct((num_heads, n_pad, 1), jnp.float32)),
        grid_spec=pltpu.PrefetchScalarGridSpec(
            num_scalar_prefetch=0,
            grid=(num_heads, n_pad // tm),
            in_specs=[
                pl.BlockSpec((tm, d_pad), lambda h, i: (i, h)),
                pl.BlockSpec((1, 1, d_pad), lambda h, i: (h, 0, 0)),
                pl.BlockSpec((1, 1, d_pad), lambda h, i: (h, 0, 0)),
            ],
            out_specs=[
                pl.BlockSpec((1, 1, tm), lambda h, i: (h, 0, i)),
                pl.BlockSpec((1, tm, 1), lambda h, i: (h, i, 0)),
            ],
        ),
        compiler_params=pltpu.CompilerParams(
            dimension_semantics=("parallel", "parallel"),
            vmem_limit_bytes=VMEM_LIMIT),
    )(feat_hd, al_p, ar_p)


# ---------------------------------------------------------------------------
# Kernel 3 (fused): masked edge softmax + aggregation, per (dst tile, head).
# Src axis is chunked; att (normalized, bf16) is written once as a side output.
# ---------------------------------------------------------------------------
def _attn_agg_kernel(adj_ref, ft_ref, el_ref, er_ref, rst_ref, att_ref,
                     *, neg_slope, chunk):
    # adj_ref : (Td, Ns)    int8   adjacency stripe   adj_t[v, u]
    # ft_ref  : (Ns, Dp)    bf16   projected src feats for this head
    # el_ref  : (1, 1, Ns)  f32    el[u] for this head
    # er_ref  : (1, Td, 1)  f32    er[v] for this head / dst tile
    # rst_ref : (Td, Dp)    f32    aggregated output tile
    # att_ref : (1, Td, Ns) bf16   normalized attention stripe
    td = adj_ref.shape[0]
    n_src = adj_ref.shape[-1]
    d_pad = ft_ref.shape[-1]
    n_chunks = n_src // chunk
    neg = jnp.float32(neg_slope)
    er = er_ref[0]                                              # (Td, 1)

    def leaky_logits(c):
        el_c = el_ref[0, :, c * chunk:(c + 1) * chunk]          # (1, Tc)
        s = el_c + er                                           # (Td, Tc)
        return jnp.maximum(s, neg * s)                          # LeakyReLU

    # Pass 1: row max (unmasked max is safe: it only conditions the exp and
    # cancels exactly in the softmax normalization).
    m = jnp.full((td, 1), -jnp.inf, jnp.float32)
    for c in range(n_chunks):
        m = jnp.maximum(m, jnp.max(leaky_logits(c), axis=-1, keepdims=True))

    # Pass 2: p = exp(s - m) * adj; accumulate denominator, un-normalized att,
    # and the aggregation acc += p @ ft (bf16 MXU, f32 accumulate).
    l = jnp.zeros((td, 1), jnp.float32)
    acc = jnp.zeros((td, d_pad), jnp.float32)
    for c in range(n_chunks):
        lo, hi = c * chunk, (c + 1) * chunk
        p = jnp.exp(leaky_logits(c) - m) * adj_ref[:, lo:hi].astype(jnp.float32)
        p_bf = p.astype(jnp.bfloat16)
        att_ref[0, :, lo:hi] = p_bf                    # un-normalized, fixed below
        l = l + jnp.sum(p, axis=-1, keepdims=True)
        acc = acc + jnp.dot(p_bf, ft_ref[lo:hi, :],
                            preferred_element_type=jnp.float32)

    # Finalize: per-row 1/denominator on the EUP; normalize rst and the
    # attention stripe in place (VMEM-resident output block).
    inv = pl.reciprocal(jnp.maximum(l, 1e-30), approx=True)     # (Td, 1)
    rst_ref[...] = acc * inv
    for c in range(n_chunks):
        lo, hi = c * chunk, (c + 1) * chunk
        a = att_ref[0, :, lo:hi].astype(jnp.float32) * inv
        att_ref[0, :, lo:hi] = a.astype(att_ref.dtype)


def fused_attention_aggregate(adj_t_i8, feat_hd, el_p, er_p, num_heads, d_pad,
                              neg_slope):
    n_pad = adj_t_i8.shape[0]
    td = TILE_D
    chunk = _pick_tile(n_pad, (512, 256, 128))
    kernel = functools.partial(_attn_agg_kernel, neg_slope=neg_slope, chunk=chunk)
    return pl.pallas_call(
        kernel,
        out_shape=(
            jax.ShapeDtypeStruct((n_pad, num_heads * d_pad), jnp.float32),
            jax.ShapeDtypeStruct((num_heads, n_pad, n_pad), jnp.bfloat16),
        ),
        grid_spec=pltpu.PrefetchScalarGridSpec(
            num_scalar_prefetch=0,
            # dst tile OUTER, head INNER: the adjacency block index (i, 0) is
            # constant across consecutive head steps -> DMA'd once per stripe.
            grid=(n_pad // td, num_heads),
            in_specs=[
                pl.BlockSpec((td, n_pad), lambda i, h: (i, 0)),        # adj_t int8
                pl.BlockSpec((n_pad, d_pad), lambda i, h: (0, h)),     # ft (head h)
                pl.BlockSpec((1, 1, n_pad), lambda i, h: (h, 0, 0)),   # el (head h)
                pl.BlockSpec((1, td, 1), lambda i, h: (h, i, 0)),      # er tile
            ],
            out_specs=[
                pl.BlockSpec((td, d_pad), lambda i, h: (i, h)),        # rst
                pl.BlockSpec((1, td, n_pad), lambda i, h: (h, i, 0)),  # att stripe
            ],
        ),
        compiler_params=pltpu.CompilerParams(
            dimension_semantics=("parallel", "parallel"),
            vmem_limit_bytes=VMEM_LIMIT),
    )(adj_t_i8, feat_hd, el_p, er_p)


# ---------------------------------------------------------------------------
# GATConv module (plain-JAX glue: padding / slicing only)
# ---------------------------------------------------------------------------
class GATConv:
    def __init__(self, in_feats, out_feats, num_heads, key, negative_slope=0.2):
        self.in_feats = in_feats
        self.out_feats = out_feats
        self.num_heads = num_heads
        self.negative_slope = negative_slope

        kw, kl, kr = jax.random.split(key, 3)
        gain = 2.0 ** 0.5  # calculate_gain('relu')
        std_w = gain * (2.0 / (in_feats + num_heads * out_feats)) ** 0.5
        self.W = std_w * jax.random.normal(
            kw, (in_feats, num_heads * out_feats), jnp.float32)
        std_a = gain * (2.0 / (1 + out_feats)) ** 0.5
        self.attn_l = std_a * jax.random.normal(kl, (num_heads, out_feats), jnp.float32)
        self.attn_r = std_a * jax.random.normal(kr, (num_heads, out_feats), jnp.float32)

        # Pre-padded parameters, built once, directly in their target dtypes.
        self.fin_pad = _round_up(in_feats, LANE)
        self.d_pad = _round_up(out_feats, LANE)
        h, d, dp = num_heads, out_feats, self.d_pad
        w3 = self.W.reshape(in_feats, h, d).astype(jnp.bfloat16)
        w_p = jnp.zeros((self.fin_pad, h, dp), jnp.bfloat16)
        self.W_p = w_p.at[:in_feats, :, :d].set(w3).reshape(self.fin_pad, h * dp)
        self.attn_l_p = jnp.zeros((h, 1, dp), jnp.bfloat16).at[:, 0, :d].set(
            self.attn_l.astype(jnp.bfloat16))
        self.attn_r_p = jnp.zeros((h, 1, dp), jnp.bfloat16).at[:, 0, :d].set(
            self.attn_r.astype(jnp.bfloat16))

    def __call__(self, adj, feat):
        n = feat.shape[0]
        h, d, dp = self.num_heads, self.out_feats, self.d_pad
        n_pad = _round_up(max(n, TILE_D), TILE_D)

        # Lane-dense zero padding, built directly in the kernels' dtypes.
        x_p = jnp.zeros((n_pad, self.fin_pad), jnp.bfloat16)
        x_p = x_p.at[:n, :self.in_feats].set(feat.astype(jnp.bfloat16))
        adj_t = jnp.zeros((n_pad, n_pad), jnp.int8)
        adj_t = adj_t.at[:n, :n].set((adj.T > 0).astype(jnp.int8))

        feat_hd = project(x_p, self.W_p)                               # (n_pad, h*dp) bf16
        el_p, er_p = attention_logits(feat_hd, self.attn_l_p,
                                      self.attn_r_p, h, dp)            # (h,1,n),(h,n,1) f32
        rst_p, att_p = fused_attention_aggregate(
            adj_t, feat_hd, el_p, er_p, h, dp, self.negative_slope)

        rst = rst_p[:n].reshape(n, h, dp)[:, :, :d]                    # (n, H, D) f32
        att = att_p[:, :n, :n]                                         # (H, dst, src) bf16
        return rst, att


# ---------------------------------------------------------------------------
# Pure-JAX reference (mirrors the kernel's bf16 quantization points)
# ---------------------------------------------------------------------------
def gat_reference(adj, feat, W, attn_l, attn_r, neg_slope):
    f32, bf = jnp.float32, jnp.bfloat16
    x = feat.astype(bf).astype(f32)
    w = W.astype(bf).astype(f32)
    al = attn_l.astype(bf).astype(f32)
    ar = attn_r.astype(bf).astype(f32)
    H, D = al.shape
    ft = (x @ w).astype(bf).astype(f32).reshape(-1, H, D)      # (N, H, D)
    el = jnp.einsum('nhd,hd->nh', ft, al)
    er = jnp.einsum('nhd,hd->nh', ft, ar)
    e = el[:, None, :] + er[None, :, :]                        # e[u, v, h]
    e = jnp.where(e > 0, e, neg_slope * e)
    mask = (adj > 0)[:, :, None]
    e = jnp.where(mask, e, -1e30)
    m = jnp.max(e, axis=0, keepdims=True)
    p = jnp.where(mask, jnp.exp(e - m), 0.0)
    a = p / jnp.maximum(jnp.sum(p, axis=0, keepdims=True), 1e-30)
    a_q = a.astype(bf).astype(f32)                             # kernel stores att in bf16
    rst = jnp.einsum('uvh,uhd->vhd', a_q, ft)
    att = jnp.transpose(a, (2, 1, 0))                          # (H, dst, src)
    return rst, att


if __name__ == "__main__":
    key = jax.random.PRNGKey(0)
    k_graph, k_feat, k_params = jax.random.split(key, 3)

    N, in_feats, out_feats, num_heads = 16, 8, 8, 4

    # Deterministic random symmetric graph with self-loops (no 0-in-degree).
    logits_g = jax.random.uniform(k_graph, (N, N))
    adj = (logits_g > 0.6).astype(jnp.float32)
    adj = jnp.maximum(adj, adj.T)
    adj = jnp.maximum(adj, jnp.eye(N, dtype=jnp.float32))

    feat = jax.random.normal(k_feat, (N, in_feats), jnp.float32)

    layer = GATConv(in_feats, out_feats, num_heads, k_params)
    rst, att = layer(adj, feat)
    jax.block_until_ready(rst)
    jax.block_until_ready(att)

    assert rst.shape == (N, num_heads, out_feats)
    assert att.shape == (num_heads, N, N)

    rst_ref, att_ref = gat_reference(adj, feat, layer.W, layer.attn_l,
                                     layer.attn_r, layer.negative_slope)
    np.testing.assert_allclose(np.asarray(rst), np.asarray(rst_ref),
                               atol=5e-2, rtol=5e-2)
    np.testing.assert_allclose(np.asarray(att.astype(jnp.float32)),
                               np.asarray(att_ref), atol=2e-2, rtol=5e-2)
    print("KERNEL_OK")
</pallas_src>

<mosaic_0001>
module attributes {stable_mosaic.version = 11 : i64} {
  func.func @_project_kernel(%arg0: i32, %arg1: i32, %arg2: i32, %arg3: memref<128x128xbf16, #tpu.memory_space<vmem>>, %arg4: memref<128x256xbf16, #tpu.memory_space<vmem>>, %arg5: memref<128x256xbf16, #tpu.memory_space<vmem>>, %arg6: memref<128x256xf32, #tpu.memory_space<vmem>>) attributes {dimension_semantics = [#tpu.dimension_semantics<parallel>, #tpu.dimension_semantics<parallel>, #tpu.dimension_semantics<arbitrary>], iteration_bounds = array<i64: 1, 2, 1>, scalar_prefetch = 0 : i64, scratch_operands = 1 : i64, tpu.core_type = #tpu.core_type<tc>, window_params = [{transform_indices = @transform_0, window_bounds = array<i64: 128, 128>}, {transform_indices = @transform_1, window_bounds = array<i64: 128, 256>}, {transform_indices = @transform_2, window_bounds = array<i64: 128, 256>}]} {
    %c0_i32 = arith.constant 0 : i32
    %0 = arith.cmpi eq, %arg2, %c0_i32 : i32
    %1 = arith.extui %0 : i1 to i32
    %c0_i32_0 = arith.constant 0 : i32
    %2 = arith.cmpi ne, %1, %c0_i32_0 : i32
    scf.if %2 {
      %cst_10 = arith.constant 0.000000e+00 : f32
      %12 = vector.broadcast %cst_10 : f32 to vector<128x256xf32>
      %c0_11 = arith.constant 0 : index
      %c0_12 = arith.constant 0 : index
      %13 = vector.load %arg6[%c0_11, %c0_12] : memref<128x256xf32, #tpu.memory_space<vmem>>, vector<128x256xf32>
      tpu.vector_store %arg6[%c0_11, %c0_12], %12 {strides = array<i32>} : memref<128x256xf32, #tpu.memory_space<vmem>>, vector<128x256xf32>,
    } else {
    }
    %c0 = arith.constant 0 : index
    %c0_1 = arith.constant 0 : index
    %3 = vector.load %arg6[%c0, %c0_1] : memref<128x256xf32, #tpu.memory_space<vmem>>, vector<128x256xf32>
    %c0_2 = arith.constant 0 : index
    %c0_3 = arith.constant 0 : index
    %4 = vector.load %arg3[%c0_2, %c0_3] : memref<128x128xbf16, #tpu.memory_space<vmem>>, vector<128x128xbf16>
    %c0_4 = arith.constant 0 : index
    %c0_5 = arith.constant 0 : index
    %5 = vector.load %arg4[%c0_4, %c0_5] : memref<128x256xbf16, #tpu.memory_space<vmem>>, vector<128x256xbf16>
    %cst = arith.constant dense<0.000000e+00> : vector<128x256xf32>
    %6 = tpu.matmul %4, %5, %cst {dimension_numbers = #tpu.dot_dimension_numbers<[1], [0], [0], [1], [0, 0, 1, 1], [], []>} : vector<128x128xbf16>, vector<128x256xbf16>, vector<128x256xf32> -> vector<128x256xf32>
    %7 = arith.addf %3, %6 : vector<128x256xf32>
    %c0_6 = arith.constant 0 : index
    %c0_7 = arith.constant 0 : index
    %8 = vector.load %arg6[%c0_6, %c0_7] : memref<128x256xf32, #tpu.memory_space<vmem>>, vector<128x256xf32>
    tpu.vector_store %arg6[%c0_6, %c0_7], %7 {strides = array<i32>} : memref<128x256xf32, #tpu.memory_space<vmem>>, vector<128x256xf32>,
    %c0_i32_8 = arith.constant 0 : i32
    %9 = arith.cmpi eq, %arg2, %c0_i32_8 : i32
    %10 = arith.extui %9 : i1 to i32
    %c0_i32_9 = arith.constant 0 : i32
    %11 = arith.cmpi ne, %10, %c0_i32_9 : i32
    scf.if %11 {
      %c0_10 = arith.constant 0 : index
      %c0_11 = arith.constant 0 : index
      %12 = vector.load %arg6[%c0_10, %c0_11] : memref<128x256xf32, #tpu.memory_space<vmem>>, vector<128x256xf32>
      %13 = arith.truncf %12 : vector<128x256xf32> to vector<128x256xbf16>
      %c0_12 = arith.constant 0 : index
      %c0_13 = arith.constant 0 : index
      %14 = vector.load %arg5[%c0_12, %c0_13] : memref<128x256xbf16, #tpu.memory_space<vmem>>, vector<128x256xbf16>
      tpu.vector_store %arg5[%c0_12, %c0_13], %13 {strides = array<i32>} : memref<128x256xbf16, #tpu.memory_space<vmem>>, vector<128x256xbf16>,
    } else {
    }
    return
  }
  func.func @transform_0(%arg0: i32, %arg1: i32, %arg2: i32) -> (i32, i32) {
    %c0_i32 = arith.constant 0 : i32
    return %arg0, %arg2 : i32, i32
  }
  func.func @transform_1(%arg0: i32, %arg1: i32, %arg2: i32) -> (i32, i32) {
    %c0_i32 = arith.constant 0 : i32
    return %arg2, %arg1 : i32, i32
  }
  func.func @transform_2(%arg0: i32, %arg1: i32, %arg2: i32) -> (i32, i32) {
    %c0_i32 = arith.constant 0 : i32
    return %arg0, %arg1 : i32, i32
  }
}

</mosaic_0001>

<bundles_post_ra>
// kernel: tpu_custom_call.1
= control target key start
LH: loop header
LB: loop body
LE: loop exit
PB: predicated region body
PF: predicated region fallthrough
CT: control target
= control target key end

     0   :  { %7 = vsyncpa [#allocation4], 0  ;;  %s1419_s0 = inlined_call_operand.hbm [shape: bf16[128,128], index: 0, kind: input, shape index: {}]   ;;  %s1420_s1 = inlined_call_operand.hbm [shape: bf16[128,512], index: 1, kind: input, shape index: {}]   ;;  %s1421_s2 = inlined_call_operand.hbm [shape: bf16[128,512], index: 2, kind: output, shape index: {}]  }
   0x1   :  { %8 = vsyncpa [#allocation7], 0 }
   0x2   :  { %10 = vsyncpa [#allocation7 + $0x1], 0 }
   0x3   :  { %11 = vsyncpa [#allocation5], 0 }
   0x4   :  { %13 = vsyncpa [#allocation5 + $0x1], 0  ;;  %s1213_s9 = smov 0   ;;  %s1215_s10 = smov 0  }
   0x5   :  { %s1217_s11 = smov 0   ;;  %s1219_s12 = smov 0  }
   0x6   :  { %s1221_s13 = smov 0   ;;  %s1223_s14 = smov 0  }
   0x7 LB: > { %s805_s15 = sadd.s32 4294967295, %s1187_s14   ;;  %s806_s16 = sadd.s32 4294967294, %s1187_s14   ;;  %s1187_s14 = sphi %s1223_s14, %s19_s14   ;;  %s1183_s13 = sphi %s1221_s13, %s1433_s13   ;;  %s1179_s12 = sphi %s1219_s12, %s1432_s12   ;;  %s1175_s11 = sphi %s1217_s11, %s1431_s11   ;;  %s1171_s10 = sphi %s1215_s10, %s1430_s10   ;;  %s1167_s9 = sphi %s1213_s9, %s1429_s9  }
   0x8   : > { %p88_p0 = scmp.ne.s32.totalorder %s1171_s10, %s1167_s9  ;;  %p1247_p1 = scmp.eq.s32.totalorder %s805_s15, 0 }
   0x9   : > { %p1251_p2 = scmp.eq.s32.totalorder %s805_s15, 1  ;;  %p120_p3 = scmp.eq.s32.totalorder %s806_s16, 1 }
   0xa   : > { %p1257_p4 = por %p1247_p1, %p88_p0  ;;  %p807_p5 = scmp.ge.s32.totalorder %s1187_s14, 1 }
   0xb   : > { %p1262_p6 = por %p120_p3, %p88_p0  ;;  %p127_p7 = scmp.lt.s32.totalorder %s1187_s14, 3 }
   0xc   : > { %s142_s23 = sshll.u32 %s1419_s0, 4  ;;  %s1189_s25 = smov [#allocation3]   ;;  %s143_s23 = int_to_ptr.hbm [resolvable:$true] %s142_s23 }
   0xd   : > { %p1270_p8 = pnand %p807_p5, %p127_p7  ;;  %s144_s26 = sshll.u32 %s1189_s25, 4  ;;  %s145_s26 = int_to_ptr.vmem [resolvable:$true] %s144_s26 }
   0xe   : > { %p809_p11 = scmp.ge.s32.totalorder %s1187_s14, 2  ;;  %s1190_s27 = smov 64  }
   0xf   : > { %p968_p9 = pneg %p1270_p8  ;;  %s1191_s28 = smov 4  }
  0x10   : > { %s34_s29 = sadd.s32 1, %s1183_s13  ;;  %s75_s30 = sadd.s32 1, %s1175_s11 }
  0x11   : > { %p969_p10 = pnand %p968_p9, %p1247_p1  ;;  %p36_p12 = scmp.ge.s32.totalorder %s34_s29, 2 }
  0x12   : > { %p82_p13 = scmp.ne.s32.totalorder %s1175_s11, %s1171_s10  ;;  %p83_p0 = scmp.eq.s32.totalorder %s1187_s14, 0 }
  0x13   : > { %971 = dma.hbm_to_vmem [thread:$0]  (!%p969_p10), %s143_s23, 1024, %s145_s26, [#allocation4], %s1190_s27, %s1190_s27, %s1191_s28  }
  0x14   : > { %s1435_s29 = smov (%p36_p12, %s34_s29), 0  ;;  %p1286_p3 = por %p83_p0, %p82_p13 }
  0x15   : > { %p1292_p5 = por %p1251_p2, %p82_p13  ;;  %s71_s5 = ssub.s32 %s1183_s13, %s1435_s29 }
  0x16   : > { %p981_p7 = scmp.lt.s32.totalorder %s1187_s14, 2  ;;  %p73_p9 = scmp.eq.s32.totalorder %s71_s5, 0 }
  0x17   : > { %s158_s6 = sand.u32 1, %s1175_s11   ;;  %s918_s15 = sshll.u32 %s1183_s13, 3 }
  0x18   : > { %s810_s7 = sshll.u32 %s158_s6, 7  ;;  %s170_s22 = scalar_lea.hbm %s1420_s1, %s918_s15 }
  0x19   : > { %s1301_s8 = scalar_select %p73_p9, %s1175_s11, %s75_s30  }
  0x1a   : > { %s162_s23 = scalar_lea.vmem [#allocation6], %s810_s7  ;;  %s171_s18 = sshll.u32 %s170_s22, 4  ;;  %s172_s18 = int_to_ptr.hbm [resolvable:$true] %s171_s18 }
  0x1b   : > { %s173_s25 = sshll.u32 %s162_s23, 4  ;;  %p973_p2 = pnand %p981_p7, %p1286_p3  ;;  %s174_s25 = int_to_ptr.vmem [resolvable:$true] %s173_s25 }
  0x1c   : > { %s159_s26 = scalar_lea.sflag [#allocation7], %s158_s6  ;;  %s1192_s27 = smov 256  }
  0x1d   : > { %s1193_s28 = smov 128   ;;  %s1194_s5 = smov 8  }
  0x1e   : > { %975 = dma.hbm_to_vmem [thread:$0]  (!%p973_p2), %s172_s18, 2048, %s174_s25, %s159_s26, %s1192_s27, %s1193_s28, %s1194_s5  }
  0x1f   : > { %185 = sbr.rel (%p1270_p8) target bundleno = 271 (0x10f), region = 28 }
  0x24   : > { %1154 = dma.done.wait (%p1247_p1), [#allocation4], 1024  }
  0x25   : > { %1156 = vsyncadd (%p1247_p1), [#allocation4], 4294966272  ;;  %s1316_s30 = sand.u32 1, %s1171_s10  }
  0x26   : > { %s815_s3 = sshll.u32 %s1316_s30, 7  ;;  %s193_s6 = scalar_lea.sflag [#allocation7], %s1316_s30 }
  0x27   : > { %s1322_s7 = scalar_lea.vmem [#allocation6], %s815_s3 }
  0x28   : > { %1158 = dma.done.wait (%p1257_p4), %s193_s6, 2048  }
  0x29   : > { %1160 = vsyncadd (%p1257_p4), %s193_s6, 4294965248  ;;  %v907_v0 = vld [vmem:[%s1322_s7 + $0x70] sm:$0xf]  ;;  %v942_v1 = vld [vmem:[%s1322_s7 + $0x74] sm:$0xf0]  ;;  %s1362_s17 = scalar_lea.vmem [#allocation8], %s815_s3 }
  0x2a   : > { %v941_v2 = vld [vmem:[%s1322_s7 + $0x74] sm:$0xf]  ;;  %v908_v3 = vor.u32 %v942_v1, %v907_v0  ;;  %v909_v4 = vld [vmem:[%s1322_s7 + $0x78] sm:$0xf0]  ;;  %v899_v5 = vld [vmem:[%s1322_s7 + $0x60] sm:$0xf] }
  0x2b   : > { %v940_v6 = vld [vmem:[%s1322_s7 + $0x64] sm:$0xf0]  ;;  %v912_v7 = vor.u32 %v941_v2, %v909_v4  ;;  %v939_v8 = vld [vmem:[%s1322_s7 + $0x64] sm:$0xf]  ;;  %v901_v9 = vld [vmem:[%s1322_s7 + $0x68] sm:$0xf0] }
  0x2c   : > { %451 = vmatpush.bf16.msra.mxu0 %v908_v3  ;;  %944 = vmatpush.bf16.msra.mxu2 %v908_v3  ;;  %v900_v10 = vor.u32 %v940_v6, %v899_v5  ;;  %v904_v11 = vor.u32 %v939_v8, %v901_v9  ;;  %v891_v12 = vld [vmem:[%s1322_s7 + $0x50] sm:$0xf]  ;;  %v938_v13 = vld [vmem:[%s1322_s7 + $0x54] sm:$0xf0]  ;;  %v937_v14 = vld [vmem:[%s1322_s7 + $0x54] sm:$0xf] }
  0x2d   : > { %500 = vmatpush.bf16.msra.mxu1 %v912_v7  ;;  %952 = vmatpush.bf16.msra.mxu3 %v912_v7  ;;  %v893_v15 = vld [vmem:[%s1322_s7 + $0x58] sm:$0xf0]  ;;  %v892_v16 = vor.u32 %v938_v13, %v891_v12  ;;  %v883_v18 = vld [vmem:[%s1322_s7 + $0x40] sm:$0xf]  ;;  %v936_v19 = vld [vmem:[%s1322_s7 + $0x44] sm:$0xf0] }
  0x2e   : > { %v896_v17 = vor.u32 %v937_v14, %v893_v15  ;;  %v935_v20 = vld [vmem:[%s1322_s7 + $0x44] sm:$0xf]  ;;  %v885_v21 = vld [vmem:[%s1322_s7 + $0x48] sm:$0xf0]  ;;  %v884_v22 = vor.u32 %v936_v19, %v883_v18  ;;  %v875_v24 = vld [vmem:[%s1322_s7 + $0x30] sm:$0xf] }
  0x2f   : > { %v888_v23 = vor.u32 %v935_v20, %v885_v21  ;;  %v934_v25 = vld [vmem:[%s1322_s7 + $0x34] sm:$0xf0]  ;;  %v933_v26 = vld [vmem:[%s1322_s7 + $0x34] sm:$0xf]  ;;  %v877_v27 = vld [vmem:[%s1322_s7 + $0x38] sm:$0xf0] }
  0x30   : > { %452 = vmatpush.bf16.msra.mxu0 %v900_v10  ;;  %945 = vmatpush.bf16.msra.mxu2 %v900_v10  ;;  %v876_v28 = vor.u32 %v934_v25, %v875_v24  ;;  %v880_v29 = vor.u32 %v933_v26, %v877_v27  ;;  %v867_v30 = vld [vmem:[%s1322_s7 + $0x20] sm:$0xf]  ;;  %v932_v31 = vld [vmem:[%s1322_s7 + $0x24] sm:$0xf0]  ;;  %v931_v32 = vld [vmem:[%s1322_s7 + $0x24] sm:$0xf] }
  0x31   : > { %501 = vmatpush.bf16.msra.mxu1 %v904_v11  ;;  %953 = vmatpush.bf16.msra.mxu3 %v904_v11  ;;  %v869_v33 = vld [vmem:[%s1322_s7 + $0x28] sm:$0xf0]  ;;  %v868_v34 = vor.u32 %v932_v31, %v867_v30  ;;  %v859_v36 = vld [vmem:[%s1322_s7 + $0x10] sm:$0xf]  ;;  %v930_v37 = vld [vmem:[%s1322_s7 + $0x14] sm:$0xf0] }
  0x32   : > { %v872_v35 = vor.u32 %v931_v32, %v869_v33  ;;  %v929_v38 = vld [vmem:[%s1322_s7 + $0x14] sm:$0xf]  ;;  %v861_v39 = vld [vmem:[%s1322_s7 + $0x18] sm:$0xf0]  ;;  %v860_v40 = vor.u32 %v930_v37, %v859_v36  ;;  %v851_v42 = vld [vmem:[%s1322_s7] sm:$0xf] }
  0x33   : > { %v864_v41 = vor.u32 %v929_v38, %v861_v39  ;;  %v928_v43 = vld [vmem:[%s1322_s7 + $0x4] sm:$0xf0]  ;;  %v927_v44 = vld [vmem:[%s1322_s7 + $0x4] sm:$0xf]  ;;  %v853_v45 = vld [vmem:[%s1322_s7 + $0x8] sm:$0xf0] }
  0x34   : > { %453 = vmatpush.bf16.msra.mxu0 %v892_v16  ;;  %946 = vmatpush.bf16.msra.mxu2 %v892_v16  ;;  %v852_v46 = vor.u32 %v928_v43, %v851_v42  ;;  %v856_v47 = vor.u32 %v927_v44, %v853_v45  ;;  %v919_v48 = vld [vmem:[#allocation3] sm:$0xff]  ;;  %v920_v50 = vld [vmem:[#allocation3 + $0x8] sm:$0xff]  ;;  %v921_v52 = vld [vmem:[#allocation3 + $0x10] sm:$0xff]  ;;  %s943_s19 = sshll.u32 %s1179_s12, 3  ;;  %s696_s21 = sshll.u32 %s1362_s17, 4  ;;  %s697_s21 = int_to_ptr.vmem [resolvable:$true] %s696_s21 }
  0x35   : > { %502 = vmatpush.bf16.msra.mxu1 %v896_v17  ;;  %954 = vmatpush.bf16.msra.mxu3 %v896_v17  ;;  %v923_v49 = vld [vmem:[#allocation3 + $0x20] sm:$0xff]  ;;  %v924_v51 = vld [vmem:[#allocation3 + $0x28] sm:$0xff]  ;;  %v925_v53 = vld [vmem:[#allocation3 + $0x30] sm:$0xff]  ;;  %s695_s16 = scalar_lea.hbm %s1421_s2, %s943_s19  ;;  %s681_s12 = scalar_lea.sflag [#allocation5], %s1316_s30 }
  0x36   : > { %v922_v54 = vld [vmem:[#allocation3 + $0x18] sm:$0xff]  ;;  %s698_s22 = sshll.u32 %s695_s16, 4  ;;  %s1121_s27 = scalar_lea.hbm %s1421_s2, 256  ;;  %s699_s22 = int_to_ptr.hbm [resolvable:$true] %s698_s22 }
  0x37   : > { %v926_v55 = vld [vmem:[#allocation3 + $0x38] sm:$0xff]  ;;  %s1115_s23 = sshra.s32 %s699_s22, 4  ;;  %s1116_s23 = int_to_ptr.hbm [resolvable:$true] %s1115_s23 }
  0x38   : > { %454 = vmatpush.bf16.msra.mxu0 %v884_v22  ;;  %947 = vmatpush.bf16.msra.mxu2 %v884_v22  ;;  %s1117_s25 = scalar_lea.hbm %s1116_s23, 128  ;;  %p1122_p10 = scmp.lt.s32.totalorder %s1116_s23, %s1421_s2 }
  0x39   : > { %503 = vmatpush.bf16.msra.mxu1 %v888_v23  ;;  %955 = vmatpush.bf16.msra.mxu3 %v888_v23  ;;  %p1118_p1 = scmp.ne.s32.totalorder %s1116_s23, %s1117_s25  ;;  %p1123_p12 = scmp.lt.s32.totalorder %s1121_s27, %s1117_s25 }
  0x3b   : > { %p1119_p4 = pnand %p1118_p1, %p1292_p5  ;;  %p1124_p13 = por %p1123_p12, %p1122_p10 }
  0x3c   : > { %455 = vmatpush.bf16.msra.mxu0 %v876_v28  ;;  %948 = vmatpush.bf16.msra.mxu2 %v876_v28 }
  0x3d   : > { %504 = vmatpush.bf16.msra.mxu1 %v880_v29  ;;  %956 = vmatpush.bf16.msra.mxu3 %v880_v29  ;;  %p1120_p8 = pneg %p1119_p4 }
  0x3f   : > { %p1125_p0 = pnand %p1124_p13, %p1120_p8 }
  0x40   : > { %456 = vmatpush.bf16.msra.mxu0 %v868_v34  ;;  %949 = vmatpush.bf16.msra.mxu2 %v868_v34 }
  0x41   : > { %505 = vmatpush.bf16.msra.mxu1 %v872_v35  ;;  %957 = vmatpush.bf16.msra.mxu3 %v872_v35 }
  0x44   : > { %457 = vmatpush.bf16.msra.mxu0 %v860_v40  ;;  %950 = vmatpush.bf16.msra.mxu2 %v860_v40 }
  0x45   : > { %506 = vmatpush.bf16.msra.mxu1 %v864_v41  ;;  %958 = vmatpush.bf16.msra.mxu3 %v864_v41 }
  0x48   : > { %458 = vmatpush.bf16.msra.mxu0 %v852_v46  ;;  %951 = vmatpush.bf16.msra.mxu2 %v852_v46 }
  0x49   : > { %507 = vmatpush.bf16.msra.mxu1 %v856_v47  ;;  %959 = vmatpush.bf16.msra.mxu3 %v856_v47 }
  0x4b   : > { %459 = vmatmul.bf16.vlgmr.msra.gmra.mxu0 %v919_v48  ;;  %479 = vmatmul.bf16.vlgmr.msra.gmra.mxu2 %v923_v49 }
  0x4c   : > { %508 = vmatmul.bf16.vlgmr.msra.gmra.mxu1 %v919_v48  ;;  %528 = vmatmul.bf16.vlgmr.msra.gmra.mxu3 %v923_v49 }
  0x5b   : > { %464 = vmatmul.bf16.gmra.mxu0 %v920_v50  ;;  %484 = vmatmul.bf16.gmra.mxu2 %v924_v51 }
  0x5c   : > { %513 = vmatmul.bf16.gmra.mxu1 %v920_v50  ;;  %533 = vmatmul.bf16.gmra.mxu3 %v924_v51 }
  0x6b   : > { %469 = vmatmul.bf16.gmra.mxu0 %v921_v52  ;;  %489 = vmatmul.bf16.gmra.mxu2 %v925_v53 }
  0x6c   : > { %518 = vmatmul.bf16.gmra.mxu1 %v921_v52  ;;  %538 = vmatmul.bf16.gmra.mxu3 %v925_v53 }
  0x7b   : > { %474 = vmatmul.bf16.gmra.mxu0 %v922_v54  ;;  %494 = vmatmul.bf16.gmra.mxu2 %v926_v55 }
  0x7c   : > { %523 = vmatmul.bf16.gmra.mxu1 %v922_v54  ;;  %543 = vmatmul.bf16.gmra.mxu3 %v926_v55 }
  0xc8   : > { %v460_v56 = vpop.f32.mrf.mxu0 }
  0xc9   : > { %v509_v57 = vpop.f32.mrf.mxu1 }
  0xca   : > { %v648_v58 = vpack.c.bf16 %v509_v57, %v460_v56 }
  0xcc   : > { %664 = vst [vmem:[%s1362_s17] sm:$0xff] %v648_v58 }
  0xce   : > { %v480_v59 = vpop.f32.mrf.mxu2 }
  0xcf   : > { %v529_v60 = vpop.f32.mrf.mxu3 }
  0xd0   : > { %v656_v61 = vpack.c.bf16 %v529_v60, %v480_v59  ;;  %v462_v62 = vpop.f32.mrf.mxu0 }
  0xd1   : > { %v511_v63 = vpop.f32.mrf.mxu1 }
  0xd2   : > { %672 = vst [vmem:[%s1362_s17 + $0x40] sm:$0xff] %v656_v61  ;;  %v649_v0 = vpack.c.bf16 %v511_v63, %v462_v62 }
  0xd4   : > { %665 = vst [vmem:[%s1362_s17 + $0x8] sm:$0xff] %v649_v0 }
  0xd6   : > { %v482_v1 = vpop.f32.mrf.mxu2 }
  0xd7   : > { %v531_v2 = vpop.f32.mrf.mxu3 }
  0xd8   : > { %v657_v3 = vpack.c.bf16 %v531_v2, %v482_v1  ;;  %v465_v4 = vpop.f32.mrf.mxu0 }
  0xd9   : > { %v514_v5 = vpop.f32.mrf.mxu1 }
  0xda   : > { %673 = vst [vmem:[%s1362_s17 + $0x48] sm:$0xff] %v657_v3  ;;  %v650_v6 = vpack.c.bf16 %v514_v5, %v465_v4 }
  0xdc   : > { %666 = vst [vmem:[%s1362_s17 + $0x10] sm:$0xff] %v650_v6 }
  0xde   : > { %v485_v7 = vpop.f32.mrf.mxu2 }
  0xdf   : > { %v534_v8 = vpop.f32.mrf.mxu3 }
  0xe0   : > { %v658_v9 = vpack.c.bf16 %v534_v8, %v485_v7  ;;  %v467_v10 = vpop.f32.mrf.mxu0 }
  0xe1   : > { %v516_v11 = vpop.f32.mrf.mxu1 }
  0xe2   : > { %674 = vst [vmem:[%s1362_s17 + $0x50] sm:$0xff] %v658_v9  ;;  %v651_v12 = vpack.c.bf16 %v516_v11, %v467_v10 }
  0xe4   : > { %667 = vst [vmem:[%s1362_s17 + $0x18] sm:$0xff] %v651_v12 }
  0xe6   : > { %v487_v13 = vpop.f32.mrf.mxu2 }
  0xe7   : > { %v536_v14 = vpop.f32.mrf.mxu3 }
  0xe8   : > { %v659_v15 = vpack.c.bf16 %v536_v14, %v487_v13  ;;  %v470_v16 = vpop.f32.mrf.mxu0 }
  0xe9   : > { %v519_v17 = vpop.f32.mrf.mxu1 }
  0xea   : > { %675 = vst [vmem:[%s1362_s17 + $0x58] sm:$0xff] %v659_v15  ;;  %v652_v18 = vpack.c.bf16 %v519_v17, %v470_v16 }
  0xec   : > { %668 = vst [vmem:[%s1362_s17 + $0x20] sm:$0xff] %v652_v18 }
  0xee   : > { %v490_v19 = vpop.f32.mrf.mxu2 }
  0xef   : > { %v539_v20 = vpop.f32.mrf.mxu3 }
  0xf0   : > { %v660_v21 = vpack.c.bf16 %v539_v20, %v490_v19  ;;  %v472_v22 = vpop.f32.mrf.mxu0 }
  0xf1   : > { %v521_v23 = vpop.f32.mrf.mxu1 }
  0xf2   : > { %676 = vst [vmem:[%s1362_s17 + $0x60] sm:$0xff] %v660_v21  ;;  %v653_v24 = vpack.c.bf16 %v521_v23, %v472_v22 }
  0xf4   : > { %669 = vst [vmem:[%s1362_s17 + $0x28] sm:$0xff] %v653_v24 }
  0xf6   : > { %v492_v25 = vpop.f32.mrf.mxu2 }
  0xf7   : > { %v541_v26 = vpop.f32.mrf.mxu3 }
  0xf8   : > { %v661_v27 = vpack.c.bf16 %v541_v26, %v492_v25  ;;  %v475_v28 = vpop.f32.mrf.mxu0 }
  0xf9   : > { %v524_v29 = vpop.f32.mrf.mxu1 }
  0xfa   : > { %677 = vst [vmem:[%s1362_s17 + $0x68] sm:$0xff] %v661_v27  ;;  %v654_v30 = vpack.c.bf16 %v524_v29, %v475_v28 }
  0xfc   : > { %670 = vst [vmem:[%s1362_s17 + $0x30] sm:$0xff] %v654_v30 }
  0xfe   : > { %v495_v31 = vpop.f32.mrf.mxu2 }
  0xff   : > { %v544_v32 = vpop.f32.mrf.mxu3 }
 0x100   : > { %v662_v33 = vpack.c.bf16 %v544_v32, %v495_v31  ;;  %v477_v34 = vpop.f32.mrf.mxu0 }
 0x101   : > { %v526_v35 = vpop.f32.mrf.mxu1 }
 0x102   : > { %678 = vst [vmem:[%s1362_s17 + $0x70] sm:$0xff] %v662_v33  ;;  %v655_v36 = vpack.c.bf16 %v526_v35, %v477_v34 }
 0x104   : > { %671 = vst [vmem:[%s1362_s17 + $0x38] sm:$0xff] %v655_v36 }
 0x106   : > { %v497_v37 = vpop.f32.mrf.mxu2 }
 0x107   : > { %v546_v38 = vpop.f32.mrf.mxu3 }
 0x108   : > { %v663_v39 = vpack.c.bf16 %v546_v38, %v497_v37 }
 0x10a   : > { %679 = vst [vmem:[%s1362_s17 + $0x78] sm:$0xff] %v663_v39 }
 0x10b   : > { %1128 = shalt.err (!%p1125_p0)
}
 0x10c   : > { %s1195_s30 = smov 128   ;;  %s1196_s3 = smov 256  }
 0x10d   : > { %s1197_s6 = smov 8  }
 0x10e   : > { %966 = dma.vmem_to_hbm [thread:$0]  (%p1292_p5), %s697_s21, 2048, %s699_s22, %s681_s12, %s1195_s30, %s1196_s3, %s1197_s6  }
 0x10f PF: > { %s713_s7 = sand.u32 1, %s1167_s9   ;;  %p977_p3 = pnand %p809_p11, %p1262_p6 }
 0x110   : > { %s714_s17 = scalar_lea.sflag [#allocation5], %s713_s7 }
 0x111   : > { %p978_p7 = pneg %p977_p3 }
 0x113   : > { %1162 = dma.done.wait (%p978_p7), %s714_s17, 2048  }
 0x114   : > { %1164 = vsyncadd (%p978_p7), %s714_s17, 4294965248  ;;  %s19_s14 = sadd.s32 1, %s1187_s14   ;;  %s1429_s9 = smov %s1171_s10 }
 0x115   : > { %p16_p9 = scmp.ge.s32.totalorder %s19_s14, 4   ;;  %s1430_s10 = smov %s1175_s11 }
 0x116   : > { %s1431_s11 = smov %s1301_s8  ;;  %s1432_s12 = smov %s1183_s13 }
 0x117   : > { %s1433_s13 = smov %s1435_s29  ;;  %18 = sbr.rel (!%p16_p9) target bundleno = 7 (0x7), region = 87 }
 0x11c   :  { %720 = vsyncpa [#allocation4], 1 }
 0x11d   :  { %722 = vsyncpa [#allocation4 + $0x1], 1 }
 0x11e   :  { %723 = vsyncpa [#allocation7], 1 }
 0x11f   :  { %725 = vsyncpa [#allocation7 + $0x1], 1 }
 0x120   :  { %726 = vsyncpa [#allocation5], 1 }
 0x121   :  { %728 = vsyncpa [#allocation5 + $0x1], 1 }

</bundles_post_ra>
